<compile_context>
chip_gen: v7x
topology: tpu7x:2x2x1
jax: 0.10.0
libtpu: 0.0.40
codegen_flags: <defaults>
</compile_context>

<pallas_src>
import jax
import jax.numpy as jnp
from jax.experimental import pallas as pl
from jax.experimental.pallas import tpu as pltpu


def _make_kernel(n_in):
    """Builds a kernel for exactly n_in layer inputs (static unroll over N)."""

    def kernel(w_ref, *refs):
        # refs = (x_0, ..., x_{n_in-1}, o_ref); each is a (TM, TC) tile.
        o_ref = refs[n_in]
        acc = w_ref[0] * refs[0][...].astype(jnp.float32)
        for i in range(1, n_in):
            acc = acc + w_ref[i] * refs[i][...].astype(jnp.float32)
        o_ref[...] = acc.astype(o_ref.dtype)

    return kernel


def _sublane_multiple(dtype):
    """Dtype-native sublane packing multiple (8 f32, 16 bf16, 32 int8/fp8)."""
    itemsize = jnp.dtype(dtype).itemsize
    if itemsize >= 4:
        return 8
    if itemsize == 2:
        return 16
    return 32


def _vmem_budgets():
    """(vmem_limit_bytes, tile_budget_bytes) derived from physical VMEM.

    v5e/v6e (128 MiB physical) -> limit 64 MiB, tile budget 48 MiB.
    v7x (64 MiB physical)      -> limit 48 MiB, tile budget 36 MiB.
    Falls back to the v7x numbers if the query is unavailable.
    """
    phys = None
    try:
        info = pltpu.get_tpu_info()
        phys = getattr(info, "vmem_capacity_bytes", None)
    except Exception:
        phys = None
    if not phys:
        phys = 64 * 1024 * 1024
    limit = min(phys * 3 // 4, 64 * 1024 * 1024)
    tile_budget = limit * 3 // 4
    return int(limit), int(tile_budget)


def _choose_slab(m, f):
    """Pick a lane-dense 2D slab (rows, cols) for the flattened (m, f) data."""
    if f % 128 == 0:
        return m, f
    total = m * f
    for cols in (2048, 1024, 512, 256, 128):
        if total % cols == 0:
            return total // cols, cols
    # TODO(synk): last dim not a multiple of 128 -> masked vst.msk partial
    # stores (~4.5x store cost); pad the feature dim upstream if this is hot.
    return m, f


def _pick_tile_cols(cols, bytes_per_elem, sm, budget):
    """Largest multiple-of-128 divisor of cols whose minimal (sm-row) tile
    set still fits the VMEM budget; cols itself when it already fits."""
    if cols % 128 != 0:
        return cols
    divisors = [d for d in range(128, cols + 1, 128) if cols % d == 0]
    for d in reversed(divisors):
        if bytes_per_elem * d * sm <= budget:
            return d
    return divisors[0]


def _pick_tile_rows(rows, tc, bytes_per_elem, sm, budget):
    """Rows per tile so all double-buffered tiles + temporaries fit budget."""
    bytes_per_row = bytes_per_elem * tc
    tm = (budget // max(bytes_per_row, 1)) // sm * sm
    tm = max(sm, tm)
    # Keep >= 4 row tiles when there is enough data, so the "parallel" row
    # axis shards evenly across v7x's 2 TensorCores (a few extra grid steps
    # cost ~1 us and are irrelevant on 1-TC v5e/v6e).
    MIN_ROW_TILES = 4
    if rows >= MIN_ROW_TILES * sm:
        cap = (rows + MIN_ROW_TILES - 1) // MIN_ROW_TILES
        cap = (cap + sm - 1) // sm * sm
        tm = min(tm, cap)
    else:
        tm = min(tm, rows)  # single (or tiny) tile; block dim == full extent
    return tm


def weighted_pass(prev_outputs, weighter):
    """prev_outputs: list of N arrays (B, S, F); weighter: (1, 1, N).
    Returns (B, S, F) = sum_i weighter[..., i] * prev_outputs[i]."""
    n_in = len(prev_outputs)
    B, S, F = prev_outputs[0].shape
    # Match PyTorch dtype promotion (inputs x f32 parameter).
    out_dtype = jnp.result_type(*(p.dtype for p in prev_outputs), weighter.dtype)

    M = B * S
    rows, cols = _choose_slab(M, F)

    # Accurate VMEM accounting per (row, col) element:
    #   2x double-buffered tiles for each input and the output at their real
    #   element sizes, plus ~2 f32 tiles for the accumulator / cast temps.
    in_elsizes = [jnp.dtype(p.dtype).itemsize for p in prev_outputs]
    out_elsize = jnp.dtype(out_dtype).itemsize
    bytes_per_elem = 2 * (sum(in_elsizes) + out_elsize) + 2 * 4

    sm = max([_sublane_multiple(p.dtype) for p in prev_outputs]
             + [_sublane_multiple(out_dtype)])

    vmem_limit, tile_budget = _vmem_budgets()
    tc = _pick_tile_cols(cols, bytes_per_elem, sm, tile_budget)
    tm = _pick_tile_rows(rows, tc, bytes_per_elem, sm, tile_budget)

    # Layout plumbing only (no compute): present each input as the same
    # lane-dense slab; flat element order is preserved, so reshaping the
    # output back is exact.
    xs = [p.reshape(rows, cols) for p in prev_outputs]
    w = weighter.reshape(n_in).astype(jnp.float32)

    tile_spec = pl.BlockSpec((tm, tc), lambda i, j: (i, j))

    out = pl.pallas_call(
        _make_kernel(n_in),
        out_shape=jax.ShapeDtypeStruct((rows, cols), out_dtype),
        grid_spec=pltpu.PrefetchScalarGridSpec(
            num_scalar_prefetch=0,
            grid=(pl.cdiv(rows, tm), pl.cdiv(cols, tc)),
            in_specs=[pl.BlockSpec(memory_space=pltpu.MemorySpace.SMEM)]  # weights
                     + [tile_spec] * n_in,                                # N layers
            out_specs=tile_spec,
        ),
        compiler_params=pltpu.CompilerParams(
            dimension_semantics=("parallel", "parallel"),
            vmem_limit_bytes=vmem_limit,
        ),
    )(w, *xs)
    return out.reshape(B, S, F)


def make_weighter(n_in):
    # Deterministic init identical to the PyTorch module: one-hot on the
    # last input layer, shape (1, 1, n_in).
    return jnp.array(
        [[[1.0 if i == n_in - 1 else 0.0 for i in range(n_in)]]],
        dtype=jnp.float32,
    )


def _reference(prev_outputs, weighter):
    stacked = jnp.stack(prev_outputs, axis=3)      # (B, S, F, N)
    return (stacked * weighter).sum(axis=3)        # broadcast (1, 1, N)


if __name__ == "__main__":
    key = jax.random.PRNGKey(0)

    # Case 1: feature < 128 (exercises the lane-dense flattening path).
    B, S, F = 2, 8, 32
    n_in = 4
    keys = jax.random.split(key, n_in + 1)
    prev_outputs = [
        jax.random.normal(keys[i], (B, S, F), dtype=jnp.float32)
        for i in range(n_in)
    ]
    # Use non-trivial weights so all N inputs contribute.
    weighter = make_weighter(n_in) + 0.25
    out = jax.block_until_ready(weighted_pass(prev_outputs, weighter))
    ref = _reference(prev_outputs, weighter)
    assert out.shape == (B, S, F)
    assert jnp.allclose(out, ref, atol=1e-5, rtol=1e-5)

    # Case 2: feature is a multiple of 128 (natural (M, F) layout path).
    B2, S2, F2 = 2, 8, 128
    n_in2 = 3
    keys2 = jax.random.split(keys[n_in], n_in2 + 1)
    prev_outputs2 = [
        jax.random.normal(keys2[i], (B2, S2, F2), dtype=jnp.float32)
        for i in range(n_in2)
    ]
    weighter2 = make_weighter(n_in2)
    out2 = jax.block_until_ready(weighted_pass(prev_outputs2, weighter2))
    ref2 = _reference(prev_outputs2, weighter2)
    assert out2.shape == (B2, S2, F2)
    assert jnp.allclose(out2, ref2, atol=1e-5, rtol=1e-5)

    # Case 3: bf16 inputs (exercises sublane-16 rounding + dtype promotion).
    B3, S3, F3 = 2, 16, 256
    n_in3 = 2
    keys3 = jax.random.split(keys2[n_in2], n_in3)
    prev_outputs3 = [
        jax.random.normal(keys3[i], (B3, S3, F3), dtype=jnp.bfloat16)
        for i in range(n_in3)
    ]
    weighter3 = make_weighter(n_in3) + 0.5
    out3 = jax.block_until_ready(weighted_pass(prev_outputs3, weighter3))
    ref3 = _reference(prev_outputs3, weighter3)
    assert out3.shape == (B3, S3, F3)
    assert out3.dtype == ref3.dtype
    assert jnp.allclose(out3, ref3, atol=1e-4, rtol=1e-4)

    print("KERNEL_OK")
</pallas_src>

<mosaic_0001>
module attributes {stable_mosaic.version = 11 : i64} {
  func.func @kernel(%arg0: i32, %arg1: i32, %arg2: memref<4xf32, #tpu.memory_space<smem>>, %arg3: memref<1x512xf32, #tpu.memory_space<vmem>>, %arg4: memref<1x512xf32, #tpu.memory_space<vmem>>, %arg5: memref<1x512xf32, #tpu.memory_space<vmem>>, %arg6: memref<1x512xf32, #tpu.memory_space<vmem>>, %arg7: memref<1x512xf32, #tpu.memory_space<vmem>>) attributes {dimension_semantics = [#tpu.dimension_semantics<parallel>, #tpu.dimension_semantics<parallel>], iteration_bounds = array<i64: 1, 1>, scalar_prefetch = 0 : i64, scratch_operands = 0 : i64, tpu.core_type = #tpu.core_type<tc>, window_params = [{transform_indices = @transform_0, window_bounds = array<i64: 4>}, {transform_indices = @transform_1, window_bounds = array<i64: 1, 512>}, {transform_indices = @transform_2, window_bounds = array<i64: 1, 512>}, {transform_indices = @transform_3, window_bounds = array<i64: 1, 512>}, {transform_indices = @transform_4, window_bounds = array<i64: 1, 512>}, {transform_indices = @transform_5, window_bounds = array<i64: 1, 512>}]} {
    %c0 = arith.constant 0 : index
    %0 = memref.load %arg2[%c0] : memref<4xf32, #tpu.memory_space<smem>>
    %c0_0 = arith.constant 0 : index
    %c0_1 = arith.constant 0 : index
    %1 = vector.load %arg3[%c0_0, %c0_1] : memref<1x512xf32, #tpu.memory_space<vmem>>, vector<1x512xf32>
    %2 = vector.broadcast %0 : f32 to vector<1x512xf32>
    %3 = arith.mulf %2, %1 : vector<1x512xf32>
    %c1 = arith.constant 1 : index
    %4 = memref.load %arg2[%c1] : memref<4xf32, #tpu.memory_space<smem>>
    %c0_2 = arith.constant 0 : index
    %c0_3 = arith.constant 0 : index
    %5 = vector.load %arg4[%c0_2, %c0_3] : memref<1x512xf32, #tpu.memory_space<vmem>>, vector<1x512xf32>
    %6 = vector.broadcast %4 : f32 to vector<1x512xf32>
    %7 = arith.mulf %6, %5 : vector<1x512xf32>
    %8 = arith.addf %3, %7 : vector<1x512xf32>
    %c2 = arith.constant 2 : index
    %9 = memref.load %arg2[%c2] : memref<4xf32, #tpu.memory_space<smem>>
    %c0_4 = arith.constant 0 : index
    %c0_5 = arith.constant 0 : index
    %10 = vector.load %arg5[%c0_4, %c0_5] : memref<1x512xf32, #tpu.memory_space<vmem>>, vector<1x512xf32>
    %11 = vector.broadcast %9 : f32 to vector<1x512xf32>
    %12 = arith.mulf %11, %10 : vector<1x512xf32>
    %13 = arith.addf %8, %12 : vector<1x512xf32>
    %c3 = arith.constant 3 : index
    %14 = memref.load %arg2[%c3] : memref<4xf32, #tpu.memory_space<smem>>
    %c0_6 = arith.constant 0 : index
    %c0_7 = arith.constant 0 : index
    %15 = vector.load %arg6[%c0_6, %c0_7] : memref<1x512xf32, #tpu.memory_space<vmem>>, vector<1x512xf32>
    %16 = vector.broadcast %14 : f32 to vector<1x512xf32>
    %17 = arith.mulf %16, %15 : vector<1x512xf32>
    %18 = arith.addf %13, %17 : vector<1x512xf32>
    %c0_8 = arith.constant 0 : index
    %c0_9 = arith.constant 0 : index
    %19 = vector.load %arg7[%c0_8, %c0_9] : memref<1x512xf32, #tpu.memory_space<vmem>>, vector<1x512xf32>
    tpu.vector_store %arg7[%c0_8, %c0_9], %18 {strides = array<i32>} : memref<1x512xf32, #tpu.memory_space<vmem>>, vector<1x512xf32>,
    return
  }
  func.func @transform_0(%arg0: i32, %arg1: i32) -> i32 {
    %c0_i32 = arith.constant 0 : i32
    %c0_i32_0 = arith.constant 0 : i32
    return %c0_i32 : i32
  }
  func.func @transform_1(%arg0: i32, %arg1: i32) -> (i32, i32) {
    %c0_i32 = arith.constant 0 : i32
    return %arg0, %arg1 : i32, i32
  }
  func.func @transform_2(%arg0: i32, %arg1: i32) -> (i32, i32) {
    %c0_i32 = arith.constant 0 : i32
    return %arg0, %arg1 : i32, i32
  }
  func.func @transform_3(%arg0: i32, %arg1: i32) -> (i32, i32) {
    %c0_i32 = arith.constant 0 : i32
    return %arg0, %arg1 : i32, i32
  }
  func.func @transform_4(%arg0: i32, %arg1: i32) -> (i32, i32) {
    %c0_i32 = arith.constant 0 : i32
    return %arg0, %arg1 : i32, i32
  }
  func.func @transform_5(%arg0: i32, %arg1: i32) -> (i32, i32) {
    %c0_i32 = arith.constant 0 : i32
    return %arg0, %arg1 : i32, i32
  }
}

</mosaic_0001>

<bundles_post_ra>
// kernel: tpu_custom_call.1
= control target key start
LH: loop header
LB: loop body
LE: loop exit
PB: predicated region body
PF: predicated region fallthrough
CT: control target
= control target key end

     0   :  { %10 = vsyncpa [#allocation5], 0  ;;  %s228_s0 = inlined_call_operand.hbm [shape: f32[4], index: 0, kind: input, shape index: {}]   ;;  %s229_s1 = inlined_call_operand.hbm [shape: f32[1,512], index: 1, kind: input, shape index: {}]   ;;  %s230_s2 = inlined_call_operand.vmem [shape: f32[1,512], index: 2, kind: input, shape index: {}]   ;;  %s231_s3 = inlined_call_operand.vmem [shape: f32[1,512], index: 3, kind: input, shape index: {}]   ;;  %s232_s4 = inlined_call_operand.vmem [shape: f32[1,512], index: 4, kind: input, shape index: {}]   ;;  %s233_s5 = inlined_call_operand.hbm [shape: f32[1,512], index: 5, kind: output, shape index: {}]  }
   0x1   :  { %11 = vsyncpa [#allocation3], 0 }
   0x2   :  { %12 = vsyncpa [#allocation4], 0  ;;  %s90_s20 = scalar_lea.hbm %s228_s0, 16 }
   0x3   :  { %p91_p0 = scmp.ne.s32.totalorder %s228_s0, %s90_s20  ;;  %p94_p1 = scmp.lt.u32.totalorder %s90_s20, %s228_s0 }
   0x5   :  { %p96_p2 = pnand %p94_p1, %p91_p0 }
   0x7   :  { %99 = shalt.err (!%p96_p2)
}
   0x8   :  { %s150_s25 = smov [#allocation2]   ;;  %s151_s28 = smov [#allocation6]  }
   0x9   :  { %20 = dma.hbm_to_smem %s228_s0, 16, %s150_s25, [#allocation5]  }
   0xa   :  { %s27_s29 = sshll.u32 %s151_s28, 4  ;;  %s100_s7 = scalar_lea.hbm %s229_s1, 64  ;;  %s28_s29 = int_to_ptr.vmem [resolvable:$true] %s27_s29 }
   0xb   :  { %p101_p3 = scmp.ne.s32.totalorder %s229_s1, %s100_s7  ;;  %p104_p4 = scmp.lt.u32.totalorder %s100_s7, %s229_s1 }
   0xd   :  { %p106_p5 = pnand %p104_p4, %p101_p3 }
   0xf   :  { %109 = shalt.err (!%p106_p5)
}
  0x10   :  { %s110_s12 = scalar_lea.vmem %s28_s29, 64  ;;  %p115_p7 = scmp.lt.s32.totalorder %s28_s29, %s28_s29 }
  0x11   :  { %p111_p6 = scmp.ne.s32.totalorder %s28_s29, %s110_s12  ;;  %p116_p8 = scmp.lt.s32.totalorder %s110_s12, %s110_s12 }
  0x13   :  { %p117_p9 = por %p116_p8, %p115_p7 }
  0x15   :  { %p118_p10 = pnand %p117_p9, %p111_p6 }
  0x17   :  { %121 = shalt.err (!%p118_p10)
}
  0x18   :  { %30 = dma.hbm_to_vmem [thread:$0]  %s229_s1, 64, %s28_s29, [#allocation3]  }
  0x19   :  { %144 = dma.done.wait [#allocation5], 16  }
  0x1a   :  { %145 = vsyncadd [#allocation5], 4294967280 }
  0x1b   :  { %146 = dma.done.wait [#allocation3], 64  }
  0x1c   :  { %147 = vsyncadd [#allocation3], 4294967232 }
  0x1d   :  { %43 = sfence }
  0x1e   :  { %s44_s14 = sld [smem:[#allocation2]]  ;;  %s84_s15 = sld [smem:[#allocation2 + $0x1]]  ;;  %v45_v0 = vld [vmem:[#allocation6] sm:$0xf]  ;;  %v49_v1 = vld [vmem:[%s230_s2] sm:$0xf]  ;;  %v63_v11 = vlaneseq }
  0x1f   :  { %s85_s16 = sld [smem:[#allocation2 + $0x2]]  ;;  %s86_s17 = sld [smem:[#allocation2 + $0x3]]  ;;  %v54_v2 = vld [vmem:[%s231_s3] sm:$0xf] }
  0x20   :  { %v59_v5 = vld [vmem:[%s232_s4] sm:$0xf]  ;;  %s152_s23 = smov [#allocation7]   ;;  %vm65_vm0 = vcmp.lt.s32.totalorder %v63_v11, 512 }
  0x21   :  { %s74_s2 = sshll.u32 %s152_s23, 4  ;;  %s75_s2 = int_to_ptr.vmem [resolvable:$true] %s74_s2 }
  0x22   :  { %s122_s3 = scalar_lea.vmem %s75_s2, 64  ;;  %p127_p12 = scmp.lt.s32.totalorder %s75_s2, %s75_s2 }
  0x23   :  { %p123_p11 = scmp.ne.s32.totalorder %s75_s2, %s122_s3  ;;  %p128_p13 = scmp.lt.s32.totalorder %s122_s3, %s122_s3 }
  0x24   :  { %v46_v3 = vstv %s44_s14  ;;  %v50_v4 = vstv %s84_s15 }
  0x25   :  { %v47_v6 = vmul.f32 %v46_v3, %v45_v0  ;;  %v51_v7 = vmul.f32 %v50_v4, %v49_v1  ;;  %v55_v8 = vstv %s85_s16  ;;  %v60_v10 = vstv %s86_s17  ;;  %p129_p0 = por %p128_p13, %p127_p12 }
  0x26   :  { %v56_v9 = vmul.f32 %v55_v8, %v54_v2  ;;  %v61_v13 = vmul.f32 %v60_v10, %v59_v5 }
  0x27   :  { %v52_v12 = vadd.f32 %v51_v7, %v47_v6  ;;  %p130_p1 = pnand %p129_p0, %p123_p11 }
  0x29   :  { %v57_v14 = vadd.f32 %v56_v9, %v52_v12 }
  0x2b   :  { %v62_v15 = vadd.f32 %v61_v13, %v57_v14 }
  0x2d   :  { %67 = vst.msk [vmem:[#allocation7] sm:$0xf] %vm65_vm0, %v62_v15 }
  0x2e   :  { %133 = shalt.err (!%p130_p1)
}
  0x2f   :  { %s134_s25 = scalar_lea.hbm %s233_s5, 64 }
  0x30   :  { %p135_p2 = scmp.ne.s32.totalorder %s233_s5, %s134_s25  ;;  %p138_p3 = scmp.lt.u32.totalorder %s134_s25, %s233_s5 }
  0x32   :  { %p140_p4 = pnand %p138_p3, %p135_p2 }
  0x34   :  { %143 = shalt.err (!%p140_p4)
}
  0x35   :  { %77 = dma.vmem_to_hbm [thread:$0]  %s75_s2, 64, %s233_s5, [#allocation4]  }
  0x36   :  { %148 = dma.done.wait [#allocation4], 64  }
  0x37   :  { %149 = vsyncadd [#allocation4], 4294967232 }
  0x38   :  { %81 = vsyncpa [#allocation3], 1 }
  0x39   :  { %82 = vsyncpa [#allocation4], 1 }
  0x3a   :  { %83 = vsyncpa [#allocation5], 1 }

</bundles_post_ra>
